<compile_context>
chip_gen: v6e
topology: v6e:2x2x1
jax: 0.10.0
libtpu: 0.0.40
codegen_flags: <defaults>
</compile_context>

<pallas_src>
import functools
import math

import jax
import jax.numpy as jnp
from jax.experimental import pallas as pl
from jax.experimental.pallas import tpu as pltpu


def _cdiv(a: int, b: int) -> int:
    return -(-a // b)


def _round_up(x: int, m: int) -> int:
    return _cdiv(x, m) * m


# Conservative per-step VMEM budget used to cap the batch block.  v7x has only
# 64 MiB physical VMEM per TensorCore (half of v5e/v6e), so stay well below it
# to keep double-buffering alive; flash-style Lk tiling should kick in at
# roughly half the v6e sequence-length threshold on v7x.
_VMEM_BUDGET_BYTES = 40 * 2**20


def _vmem_bytes_estimate(bt, lq, lk, lk_p, in_dim, hid, in_itemsize):
    q_blk = bt * lq * in_dim * in_itemsize
    k_blk = bt * lk * in_dim * in_itemsize
    o_blk = bt * lq * lk_p * 4
    w_blk = 2 * in_dim * hid * in_itemsize
    kwpad = bt * lk_p * hid * 4                       # VMEM scratch (not 2x buffered)
    live = 2 * bt * lq * lk_p * 4 + bt * (lq + lk_p) * hid * 4   # scores/exp + projections
    return 2 * (q_blk + k_blk + o_blk + w_blk) + kwpad + live


def _attention_kernel(q_ref, k_ref, wq_ref, wk_ref, o_ref, *scratch,
                      bt, lq, lk, scale):
    """One grid step over a block of `bt` batches.

    q_ref : (bt*lq, in_dim)   k_ref : (bt*lk, in_dim)   (flattened in wrapper)
    wq_ref/wk_ref : (in_dim, hid)
    o_ref : (bt, lq, lk_p)    lk_p multiple of 128 -> dense, unmasked stores
    scratch[0] (only when lk < lk_p): (bt, lk_p, hid) f32 VMEM for lane-padded KW
    """
    hid = wq_ref.shape[1]
    lk_p = o_ref.shape[-1]

    # --- Projections: one tall (bt*L, in_dim) @ (in_dim, hid) matmul each ----
    # (batch folded into the MXU M dimension; inputs may be bf16, accumulate f32)
    qw = (jnp.dot(q_ref[...], wq_ref[...], preferred_element_type=jnp.float32)
          * scale).reshape(bt, lq, hid)               # scale folded into Q proj
    kw = jnp.dot(k_ref[...], wk_ref[...],
                 preferred_element_type=jnp.float32).reshape(bt, lk, hid)

    # --- VMEM-only lane padding of the projected K block (no HBM pad of K) ---
    if lk < lk_p:                                     # static (trace-time) branch
        kwp_ref = scratch[0]
        kwp_ref[...] = jnp.zeros_like(kwp_ref)
        kwp_ref[:, :lk, :] = kw
        kw_full = kwp_ref[...]                        # (bt, lk_p, hid)
    else:
        kw_full = kw

    # --- Scores: contract hid directly (batched), no explicit transpose ------
    scores = jnp.einsum("bqh,bkh->bqk", qw, kw_full,
                        preferred_element_type=jnp.float32)   # (bt, lq, lk_p)

    # Mask padded columns via a lane-only (1,1,lk_p) iota and let where() broadcast.
    if lk < lk_p:
        col = jax.lax.broadcasted_iota(jnp.int32, (1, 1, lk_p), 2)
        scores = jnp.where(col < lk, scores, -1e30)

    # --- Numerically stable softmax over the lane-dense last axis ------------
    m = jnp.max(scores, axis=-1, keepdims=True)
    e = jnp.exp(scores - m)
    denom = jnp.sum(e, axis=-1, keepdims=True)
    inv = pl.reciprocal(denom, approx=True)           # EUP slot (otherwise idle)
    inv = inv * (2.0 - denom * inv)                   # 1 Newton-Raphson step -> ~f32 accuracy
    o_ref[...] = (e * inv).astype(o_ref.dtype)

    # TODO(synk): flash-style Lk tiling (online softmax with m/l/acc scratch and
    # an "arbitrary" Lk grid axis) is required before bt*Lq*Lk_p*4 bytes
    # approaches the VMEM budget; on v7x (64 MiB) trip that path at roughly half
    # the v6e sequence length.


def attention_pallas(Q, K, W_Q, W_K, *, batch_block=8, matmul_dtype=None):
    """Q: (B, Lq, in_dim), K: (B, Lk, in_dim) -> softmax attention weights (B, Lq, Lk).

    matmul_dtype: set to jnp.bfloat16 for real sizes (2-3x MXU throughput on
    v6e/v7x, half the input DMA); softmax math stays f32 either way.
    On v7x pass batch_block=ceil(B/2) so the "parallel" axis exposes >=2 steps
    for the two TensorCores (keep a single step for tiny problems on v5e/v6e).
    """
    B, Lq, in_dim = Q.shape
    _, Lk, _ = K.shape
    hid = W_Q.shape[1]

    in_dtype = jnp.dtype(matmul_dtype) if matmul_dtype is not None else Q.dtype
    itemsize = in_dtype.itemsize

    # Only the OUTPUT lane axis is padded (to 128) -> dense stores; K/Q stay unpadded.
    Lk_p = _round_up(Lk, 128)

    # --- Batch blocking: cap by VMEM, then rebalance to minimize padding -----
    Bt = max(1, min(B, batch_block))
    while Bt > 1 and _vmem_bytes_estimate(Bt, Lq, Lk, Lk_p, in_dim, hid,
                                          itemsize) > _VMEM_BUDGET_BYTES:
        Bt -= 1
    nb = _cdiv(B, Bt)
    Bt = _cdiv(B, nb)                 # rebalanced: at most nb*Bt - B < nb dead batches
    if nb > 1 and ((Bt * Lq) % 8 != 0 or (Bt * Lk) % 8 != 0):
        # Flattened 2-D input blocks need 8-aligned sublane extents when the
        # block is smaller than the full (flattened) array.
        nb, Bt = 1, B
    B_p = nb * Bt

    # --- Wrapper-side prep: cast only if needed, pad batch only if needed ----
    def _prep(x):
        return x if x.dtype == in_dtype else x.astype(in_dtype)

    Qp, Kp = _prep(Q), _prep(K)
    Wq, Wk = _prep(W_Q), _prep(W_K)
    if B_p > B:
        Qp = jnp.pad(Qp, ((0, B_p - B), (0, 0), (0, 0)))
        Kp = jnp.pad(Kp, ((0, B_p - B), (0, 0), (0, 0)))
    # Free row-major reshapes: the DMA lands the data already flat (no in-kernel
    # ref-load reshape / relayout risk).
    Qf = Qp.reshape(B_p * Lq, in_dim)
    Kf = Kp.reshape(B_p * Lk, in_dim)

    kernel = functools.partial(
        _attention_kernel,
        bt=Bt, lq=Lq, lk=Lk,
        scale=1.0 / math.sqrt(float(in_dim)),
    )

    needs_lane_pad = Lk < Lk_p
    scratch_shapes = ([pltpu.VMEM((Bt, Lk_p, hid), jnp.float32)]
                      if needs_lane_pad else [])

    vmem_est = _vmem_bytes_estimate(Bt, Lq, Lk, Lk_p, in_dim, hid, itemsize)
    vmem_limit = int(min(96 * 2**20, max(32 * 2**20, 2 * vmem_est)))

    flops = (2 * B_p * Lq * in_dim * hid          # Q projection
             + 2 * B_p * Lk * in_dim * hid        # K projection
             + 2 * B_p * Lq * Lk_p * hid)         # scores einsum
    cost = pl.CostEstimate(
        flops=flops,
        transcendentals=B_p * Lq * Lk_p,          # exp
        bytes_accessed=(Qf.size + Kf.size + Wq.size + Wk.size) * itemsize
                       + B_p * Lq * Lk_p * 4,
    )

    out_padded = pl.pallas_call(
        kernel,
        out_shape=jax.ShapeDtypeStruct((B_p, Lq, Lk_p), jnp.float32),
        grid_spec=pltpu.PrefetchScalarGridSpec(
            num_scalar_prefetch=0,
            grid=(nb,),
            in_specs=[
                pl.BlockSpec((Bt * Lq, in_dim), lambda b: (b, 0)),
                pl.BlockSpec((Bt * Lk, in_dim), lambda b: (b, 0)),
                # Constant block index -> weights stay resident across steps.
                pl.BlockSpec((in_dim, hid), lambda b: (0, 0)),
                pl.BlockSpec((in_dim, hid), lambda b: (0, 0)),
            ],
            out_specs=pl.BlockSpec((Bt, Lq, Lk_p), lambda b: (b, 0, 0)),
            scratch_shapes=scratch_shapes,
        ),
        compiler_params=pltpu.CompilerParams(
            dimension_semantics=("parallel",),    # batch-block axis -> megacore on v7x
            vmem_limit_bytes=vmem_limit,          # explicit (v5e default is only 16 MiB)
        ),
        cost_estimate=cost,
    )(Qf, Kf, Wq, Wk)

    return out_padded[:B, :, :Lk]


def attention_ref(Q, K, W_Q, W_K):
    """Pure-JAX reference mirroring the forward path (mask=None)."""
    QW_Q = jnp.matmul(Q, W_Q)                       # (B, Lq, hid)
    KW_K = jnp.matmul(K, W_K)                       # (B, Lk, hid)
    KW_K = jnp.transpose(KW_K, (0, 2, 1))           # (B, hid, Lk)
    att_w = jnp.matmul(QW_Q, KW_K)                  # (B, Lq, Lk)
    att_w = att_w / jnp.sqrt(jnp.float32(Q.shape[-1]))
    return jax.nn.softmax(att_w, axis=-1)


def xavier_uniform(key, shape, gain):
    fan_in, fan_out = shape
    bound = gain * math.sqrt(6.0 / (fan_in + fan_out))
    return jax.random.uniform(key, shape, jnp.float32, -bound, bound)


if __name__ == "__main__":
    # Small shapes consistent with the module's 3-D input path.
    B, Lq, Lk, in_dim, hid_dim = 2, 8, 8, 32, 32

    key = jax.random.PRNGKey(0)
    k_q, k_k, k_wq, k_wk = jax.random.split(key, 4)

    Q = jax.random.normal(k_q, (B, Lq, in_dim), jnp.float32)
    K = jax.random.normal(k_k, (B, Lk, in_dim), jnp.float32)
    W_Q = xavier_uniform(k_wq, (in_dim, hid_dim), gain=1.414)
    W_K = xavier_uniform(k_wk, (in_dim, hid_dim), gain=1.414)

    out = attention_pallas(Q, K, W_Q, W_K)
    out = jax.block_until_ready(out)

    ref = attention_ref(Q, K, W_Q, W_K)
    assert out.shape == (B, Lq, Lk)
    # approx reciprocal + 1 Newton-Raphson step -> near-f32 normalization.
    assert jnp.allclose(out, ref, atol=1e-4, rtol=1e-4), "mismatch vs reference"
    # TODO(synk): mask branch (th.where(mask==1, att_w.double(), -1e10)) not
    # implemented — the forward is exercised with mask=None and float64 has no
    # TPU-native dtype.
    print("KERNEL_OK")
</pallas_src>

<mosaic_0001>
module attributes {stable_mosaic.version = 11 : i64} {
  func.func @_attention_kernel(%arg0: i32, %arg1: memref<16x32xf32, #tpu.memory_space<vmem>>, %arg2: memref<16x32xf32, #tpu.memory_space<vmem>>, %arg3: memref<32x32xf32, #tpu.memory_space<vmem>>, %arg4: memref<32x32xf32, #tpu.memory_space<vmem>>, %arg5: memref<2x8x128xf32, #tpu.memory_space<vmem>>, %arg6: memref<2x128x32xf32, #tpu.memory_space<vmem>>) attributes {dimension_semantics = [#tpu.dimension_semantics<parallel>], iteration_bounds = array<i64: 1>, scalar_prefetch = 0 : i64, scratch_operands = 1 : i64, tpu.core_type = #tpu.core_type<tc>, window_params = [{transform_indices = @transform_0, window_bounds = array<i64: 16, 32>}, {transform_indices = @transform_1, window_bounds = array<i64: 16, 32>}, {pipeline_mode = #tpu.pipeline_mode<synchronous>, transform_indices = @transform_2, window_bounds = array<i64: 32, 32>}, {pipeline_mode = #tpu.pipeline_mode<synchronous>, transform_indices = @transform_3, window_bounds = array<i64: 32, 32>}, {transform_indices = @transform_4, window_bounds = array<i64: 2, 8, 128>}]} {
    %c0 = arith.constant 0 : index
    %c0_0 = arith.constant 0 : index
    %0 = vector.load %arg1[%c0, %c0_0] : memref<16x32xf32, #tpu.memory_space<vmem>>, vector<16x32xf32>
    %c0_1 = arith.constant 0 : index
    %c0_2 = arith.constant 0 : index
    %1 = vector.load %arg3[%c0_1, %c0_2] : memref<32x32xf32, #tpu.memory_space<vmem>>, vector<32x32xf32>
    %cst = arith.constant dense<0.000000e+00> : vector<16x32xf32>
    %2 = tpu.matmul %0, %1, %cst {dimension_numbers = #tpu.dot_dimension_numbers<[1], [0], [0], [1], [0, 0, 1, 1], [], []>} : vector<16x32xf32>, vector<32x32xf32>, vector<16x32xf32> -> vector<16x32xf32>
    %cst_3 = arith.constant 0.176776692 : f32
    %3 = vector.broadcast %cst_3 : f32 to vector<16x32xf32>
    %4 = arith.mulf %2, %3 : vector<16x32xf32>
    %5 = vector.shape_cast %4 : vector<16x32xf32> to vector<2x8x32xf32>
    %c0_4 = arith.constant 0 : index
    %c0_5 = arith.constant 0 : index
    %6 = vector.load %arg2[%c0_4, %c0_5] : memref<16x32xf32, #tpu.memory_space<vmem>>, vector<16x32xf32>
    %c0_6 = arith.constant 0 : index
    %c0_7 = arith.constant 0 : index
    %7 = vector.load %arg4[%c0_6, %c0_7] : memref<32x32xf32, #tpu.memory_space<vmem>>, vector<32x32xf32>
    %cst_8 = arith.constant dense<0.000000e+00> : vector<16x32xf32>
    %8 = tpu.matmul %6, %7, %cst_8 {dimension_numbers = #tpu.dot_dimension_numbers<[1], [0], [0], [1], [0, 0, 1, 1], [], []>} : vector<16x32xf32>, vector<32x32xf32>, vector<16x32xf32> -> vector<16x32xf32>
    %9 = vector.shape_cast %8 : vector<16x32xf32> to vector<2x8x32xf32>
    %cst_9 = arith.constant 0.000000e+00 : f32
    %10 = vector.broadcast %cst_9 : f32 to vector<2x128x32xf32>
    %c0_10 = arith.constant 0 : index
    %c0_11 = arith.constant 0 : index
    %c0_12 = arith.constant 0 : index
    %11 = vector.load %arg6[%c0_10, %c0_11, %c0_12] : memref<2x128x32xf32, #tpu.memory_space<vmem>>, vector<2x128x32xf32>
    tpu.vector_store %arg6[%c0_10, %c0_11, %c0_12], %10 {strides = array<i32>} : memref<2x128x32xf32, #tpu.memory_space<vmem>>, vector<2x128x32xf32>,
    %c0_13 = arith.constant 0 : index
    %c0_14 = arith.constant 0 : index
    %c0_15 = arith.constant 0 : index
    %12 = vector.load %arg6[%c0_13, %c0_14, %c0_15] : memref<2x128x32xf32, #tpu.memory_space<vmem>>, vector<2x8x32xf32>
    tpu.vector_store %arg6[%c0_13, %c0_14, %c0_15], %9 {strides = array<i32>} : memref<2x128x32xf32, #tpu.memory_space<vmem>>, vector<2x8x32xf32>,
    %c0_16 = arith.constant 0 : index
    %c0_17 = arith.constant 0 : index
    %c0_18 = arith.constant 0 : index
    %13 = vector.load %arg6[%c0_16, %c0_17, %c0_18] : memref<2x128x32xf32, #tpu.memory_space<vmem>>, vector<2x128x32xf32>
    "tpu.trace_start"() <{level = 10 : i32, message = "bqh,bkh->bqk"}> : () -> ()
    %cst_19 = arith.constant dense<0.000000e+00> : vector<2x8x128xf32>
    %14 = tpu.matmul %5, %13, %cst_19 {dimension_numbers = #tpu.dot_dimension_numbers<[2], [2], [1], [1], [0, 0, 0, 1, 1, 1], [0], [0]>} : vector<2x8x32xf32>, vector<2x128x32xf32>, vector<2x8x128xf32> -> vector<2x8x128xf32>
    "tpu.trace_stop"() : () -> ()
    %15 = tpu.iota {dimensions = array<i32: 2>} : vector<1x1x128xi32>
    %c8_i32 = arith.constant 8 : i32
    %16 = vector.broadcast %c8_i32 : i32 to vector<1x1x128xi32>
    %17 = arith.cmpi slt, %15, %16 : vector<1x1x128xi32>
    %cst_20 = arith.constant -1.000000e+30 : f32
    %18 = vector.shape_cast %17 : vector<1x1x128xi1> to vector<1x1x128xi1>
    %19 = vector.broadcast %18 : vector<1x1x128xi1> to vector<2x8x128xi1>
    %20 = vector.broadcast %cst_20 : f32 to vector<2x8x128xf32>
    %21 = arith.select %19, %14, %20 : vector<2x8x128xi1>, vector<2x8x128xf32>
    %cst_21 = arith.constant dense<0xFF800000> : vector<2x8xf32>
    %22 = vector.multi_reduction <maximumf>, %21, %cst_21 [2] : vector<2x8x128xf32> to vector<2x8xf32>
    %23 = vector.shape_cast %22 : vector<2x8xf32> to vector<2x8x1xf32>
    %24 = vector.broadcast %23 : vector<2x8x1xf32> to vector<2x8x128xf32>
    %25 = arith.subf %21, %24 : vector<2x8x128xf32>
    %26 = math.exp %25 : vector<2x8x128xf32>
    %cst_22 = arith.constant dense<0.000000e+00> : vector<2x8xf32>
    %27 = vector.multi_reduction <add>, %26, %cst_22 [2] : vector<2x8x128xf32> to vector<2x8xf32>
    %28 = vector.shape_cast %27 : vector<2x8xf32> to vector<2x8x1xf32>
    %29 = tpu.reciprocal %28 {approx = true} : vector<2x8x1xf32> -> vector<2x8x1xf32>
    %30 = arith.mulf %28, %29 : vector<2x8x1xf32>
    %cst_23 = arith.constant 2.000000e+00 : f32
    %31 = vector.broadcast %cst_23 : f32 to vector<2x8x1xf32>
    %32 = arith.subf %31, %30 : vector<2x8x1xf32>
    %33 = arith.mulf %29, %32 : vector<2x8x1xf32>
    %34 = vector.broadcast %33 : vector<2x8x1xf32> to vector<2x8x128xf32>
    %35 = arith.mulf %26, %34 : vector<2x8x128xf32>
    %c0_24 = arith.constant 0 : index
    %c0_25 = arith.constant 0 : index
    %c0_26 = arith.constant 0 : index
    %36 = vector.load %arg5[%c0_24, %c0_25, %c0_26] : memref<2x8x128xf32, #tpu.memory_space<vmem>>, vector<2x8x128xf32>
    tpu.vector_store %arg5[%c0_24, %c0_25, %c0_26], %35 {strides = array<i32>} : memref<2x8x128xf32, #tpu.memory_space<vmem>>, vector<2x8x128xf32>,
    return
  }
  func.func @transform_0(%arg0: i32) -> (i32, i32) {
    %c0_i32 = arith.constant 0 : i32
    %c0_i32_0 = arith.constant 0 : i32
    return %arg0, %c0_i32 : i32, i32
  }
  func.func @transform_1(%arg0: i32) -> (i32, i32) {
    %c0_i32 = arith.constant 0 : i32
    %c0_i32_0 = arith.constant 0 : i32
    return %arg0, %c0_i32 : i32, i32
  }
  func.func @transform_2(%arg0: i32) -> (i32, i32) {
    %c0_i32 = arith.constant 0 : i32
    %c0_i32_0 = arith.constant 0 : i32
    %c0_i32_1 = arith.constant 0 : i32
    return %c0_i32, %c0_i32_0 : i32, i32
  }
  func.func @transform_3(%arg0: i32) -> (i32, i32) {
    %c0_i32 = arith.constant 0 : i32
    %c0_i32_0 = arith.constant 0 : i32
    %c0_i32_1 = arith.constant 0 : i32
    return %c0_i32, %c0_i32_0 : i32, i32
  }
  func.func @transform_4(%arg0: i32) -> (i32, i32, i32) {
    %c0_i32 = arith.constant 0 : i32
    %c0_i32_0 = arith.constant 0 : i32
    %c0_i32_1 = arith.constant 0 : i32
    return %arg0, %c0_i32, %c0_i32_0 : i32, i32, i32
  }
}

</mosaic_0001>

<bundles_post_ra>
// kernel: tpu_custom_call.1
= control target key start
LH: loop header
LB: loop body
LE: loop exit
PB: predicated region body
PF: predicated region fallthrough
CT: control target
= control target key end

     0   :  { %9 = vsyncpa [#allocation4], 0  ;;  %s1113_s0 = inlined_call_operand.hbm [shape: f32[16,32], index: 0, kind: input, shape index: {}]   ;;  %s1114_s1 = inlined_call_operand.hbm [shape: f32[16,32], index: 1, kind: input, shape index: {}]   ;;  %s1115_s2 = inlined_call_operand.hbm [shape: f32[32,32], index: 2, kind: input, shape index: {}]   ;;  %s1116_s3 = inlined_call_operand.hbm [shape: f32[32,32], index: 3, kind: input, shape index: {}]   ;;  %s1117_s4 = inlined_call_operand.hbm [shape: f32[2,8,128], index: 4, kind: output, shape index: {}]  }
   0x1   :  { %10 = vsyncpa [#allocation7], 0 }
   0x2   :  { %11 = vsyncpa [#allocation10], 0 }
   0x3   :  { %12 = vsyncpa [#allocation5], 0  ;;  %s911_s15 = smov [#allocation6]   ;;  %s912_s17 = smov [#allocation3]  }
   0x4   :  { %s30_s16 = sshll.u32 %s911_s15, 4  ;;  %s18_s18 = sshll.u32 %s912_s17, 4  ;;  %s31_s16 = int_to_ptr.vmem [resolvable:$true] %s30_s16  ;;  %s19_s18 = int_to_ptr.vmem [resolvable:$true] %s18_s18 }
   0x5   :  { %s811_s19 = scalar_lea.vmem %s31_s16, 256  ;;  %p816_p1 = scmp.lt.s32.totalorder %s31_s16, %s31_s16 }
   0x6   :  { %p812_p0 = scmp.ne.s32.totalorder %s31_s16, %s811_s19  ;;  %p817_p2 = scmp.lt.s32.totalorder %s811_s19, %s811_s19 }
   0x8   :  { %p818_p3 = por %p817_p2, %p816_p1 }
   0xa   :  { %p819_p4 = pnand %p818_p3, %p812_p0 }
   0xc   :  { %822 = shalt.err (!%p819_p4)
}
   0xd   :  { %s913_s20 = smov 128   ;;  %s914_s21 = smov 8  }
   0xe   :  { %36 = dma.hbm_to_vmem [thread:$0]  %s1114_s1, 256, %s31_s16, [#allocation7], %s913_s20, %s913_s20, %s914_s21  }
   0xf   :  { %s831_s24 = scalar_lea.vmem %s19_s18, 256  ;;  %p836_p6 = scmp.lt.s32.totalorder %s19_s18, %s19_s18 }
  0x10   :  { %p832_p5 = scmp.ne.s32.totalorder %s19_s18, %s831_s24  ;;  %p837_p7 = scmp.lt.s32.totalorder %s831_s24, %s831_s24 }
  0x12   :  { %p838_p8 = por %p837_p7, %p836_p6 }
  0x14   :  { %p839_p9 = pnand %p838_p8, %p832_p5 }
  0x16   :  { %842 = shalt.err (!%p839_p9)
}
  0x17   :  { %24 = dma.hbm_to_vmem [thread:$0]  %s1113_s0, 256, %s19_s18, [#allocation4], %s913_s20, %s913_s20, %s914_s21  }
  0x18   :  { %s915_s27 = smov [#allocation8]   ;;  %s916_s29 = smov [#allocation9]  }
  0x19   :  { %s42_s28 = sshll.u32 %s915_s27, 4  ;;  %s54_s30 = sshll.u32 %s916_s29, 4  ;;  %s43_s28 = int_to_ptr.vmem [resolvable:$true] %s42_s28  ;;  %s55_s30 = int_to_ptr.vmem [resolvable:$true] %s54_s30 }
  0x1a   :  { %s851_s1 = scalar_lea.vmem %s43_s28, 512  ;;  %p856_p11 = scmp.lt.s32.totalorder %s43_s28, %s43_s28 }
  0x1b   :  { %p852_p10 = scmp.ne.s32.totalorder %s43_s28, %s851_s1  ;;  %p857_p12 = scmp.lt.s32.totalorder %s851_s1, %s851_s1 }
  0x1d   :  { %p858_p13 = por %p857_p12, %p856_p11 }
  0x1f   :  { %p859_p0 = pnand %p858_p13, %p852_p10 }
  0x21   :  { %862 = shalt.err (!%p859_p0)
}
  0x22   :  { %48 = dma.hbm_to_vmem [thread:$0]  %s1115_s2, 512, %s43_s28, [#allocation7], %s913_s20, %s913_s20, %s914_s21  }
  0x23   :  { %s871_s0 = scalar_lea.vmem %s55_s30, 512  ;;  %p876_p2 = scmp.lt.s32.totalorder %s55_s30, %s55_s30 }
  0x24   :  { %p872_p1 = scmp.ne.s32.totalorder %s55_s30, %s871_s0  ;;  %p877_p3 = scmp.lt.s32.totalorder %s871_s0, %s871_s0 }
  0x26   :  { %p878_p4 = por %p877_p3, %p876_p2 }
  0x28   :  { %p879_p5 = pnand %p878_p4, %p872_p1 }
  0x2a   :  { %882 = shalt.err (!%p879_p5)
}
  0x2b   :  { %60 = dma.hbm_to_vmem [thread:$0]  %s1116_s3, 512, %s55_s30, [#allocation10], %s913_s20, %s913_s20, %s914_s21  }
  0x2c   :  { %903 = dma.done.wait [#allocation4], 256  }
  0x2d   :  { %904 = vsyncadd [#allocation4], 4294967040 }
  0x2e   :  { %905 = dma.done.wait [#allocation7], 768  }
  0x2f   :  { %906 = vsyncadd [#allocation7], 4294966528 }
  0x30   :  { %907 = dma.done.wait [#allocation10], 512  }
  0x31   :  { %908 = vsyncadd [#allocation10], 4294966784  ;;  %vm79_vm0 = vcmask 261120   ;;  %v917_v0 = vmov 0.0   ;;  %v168_v1 = vld [vmem:[#allocation9 + $0x18] sm:$0xff]  ;;  %v167_v2 = vld [vmem:[#allocation9 + $0x10] sm:$0xff]  ;;  %v558_v51 = vlaneseq }
  0x32   :  { %250 = vst.msk [vmem:[#allocation2] sm:$0xff] %vm79_vm0, %v917_v0  ;;  %251 = vst.msk [vmem:[#allocation2 + $0x8] sm:$0xff] %vm79_vm0, %v917_v0  ;;  %705 = vmatprep.subr.mxu1 %v168_v1  ;;  %v78_v3 = vld [vmem:[#allocation8 + $0x18] sm:$0xff]  ;;  %v163_v4 = vld [vmem:[#allocation6] sm:$0xff]  ;;  %vm918_vm1 = vmmov 0   ;;  %s919_s2 = smov [#allocation11]  }
  0x33   :  { %252 = vst.msk [vmem:[#allocation2 + $0x10] sm:$0xff] %vm79_vm0, %v917_v0  ;;  %253 = vst.msk [vmem:[#allocation2 + $0x18] sm:$0xff] %vm79_vm0, %v917_v0  ;;  %706 = vmatpush3.msra.mxu1 %v168_v1  ;;  %v166_v5 = vld [vmem:[#allocation9 + $0x8] sm:$0xff]  ;;  %694 = vmatprep.subr.mxu0 %v78_v3  ;;  %v77_v6 = vld [vmem:[#allocation8 + $0x10] sm:$0xff]  ;;  %v559_v52 = vand.u32 127, %v558_v51  ;;  %s596_s3 = sshll.u32 %s919_s2, 4  ;;  %s597_s3 = int_to_ptr.vmem [resolvable:$true] %s596_s3 }
  0x34   :  { %254 = vst.msk [vmem:[#allocation2 + $0x20] sm:$0xff] %vm79_vm0, %v917_v0  ;;  %255 = vst.msk [vmem:[#allocation2 + $0x28] sm:$0xff] %vm79_vm0, %v917_v0  ;;  %707 = vmatprep.subr.mxu1 %v167_v2  ;;  %713 = vmatprep.mubr.msk.f32.mxu1 %vm79_vm0, %v163_v4  ;;  %v165_v7 = vld [vmem:[#allocation9] sm:$0xff]  ;;  %v76_v8 = vld [vmem:[#allocation8 + $0x8] sm:$0xff]  ;;  %s883_s9 = scalar_lea.vmem %s597_s3, 256  ;;  %p888_p7 = scmp.lt.s32.totalorder %s597_s3, %s597_s3 }
  0x35   :  { %256 = vst.msk [vmem:[#allocation2 + $0x30] sm:$0xff] %vm79_vm0, %v917_v0  ;;  %257 = vst.msk [vmem:[#allocation2 + $0x38] sm:$0xff] %vm79_vm0, %v917_v0  ;;  %708 = vmatpush3.msra.mxu1 %v167_v2  ;;  %695 = vmatpush3.msra.mxu0 %v78_v3  ;;  %v164_v9 = vld [vmem:[#allocation6 + $0x8] sm:$0xff]  ;;  %v75_v10 = vld [vmem:[#allocation8] sm:$0xff]  ;;  %vm560_vm2 = vcmp.lt.s32.totalorder %v559_v52, 8  ;;  %p884_p6 = scmp.ne.s32.totalorder %s597_s3, %s883_s9  ;;  %p889_p8 = scmp.lt.s32.totalorder %s883_s9, %s883_s9 }
  0x36   :  { %258 = vst.msk [vmem:[#allocation2 + $0x40] sm:$0xff] %vm79_vm0, %v917_v0  ;;  %259 = vst.msk [vmem:[#allocation2 + $0x48] sm:$0xff] %vm79_vm0, %v917_v0  ;;  %709 = vmatprep.subr.mxu1 %v166_v5  ;;  %696 = vmatprep.subr.mxu0 %v77_v6  ;;  %v73_v11 = vld [vmem:[#allocation3] sm:$0xff]  ;;  %v74_v12 = vld [vmem:[#allocation3 + $0x8] sm:$0xff] }
  0x37   :  { %260 = vst.msk [vmem:[#allocation2 + $0x50] sm:$0xff] %vm79_vm0, %v917_v0  ;;  %261 = vst.msk [vmem:[#allocation2 + $0x58] sm:$0xff] %vm79_vm0, %v917_v0  ;;  %710 = vmatpush3.msra.mxu1 %v166_v5  ;;  %697 = vmatpush3.msra.mxu0 %v77_v6  ;;  %p890_p9 = por %p889_p8, %p888_p7 }
  0x38   :  { %262 = vst.msk [vmem:[#allocation2 + $0x60] sm:$0xff] %vm79_vm0, %v917_v0  ;;  %263 = vst.msk [vmem:[#allocation2 + $0x68] sm:$0xff] %vm79_vm0, %v917_v0  ;;  %711 = vmatprep.subr.mxu1 %v165_v7  ;;  %698 = vmatprep.subr.mxu0 %v76_v8 }
  0x39   :  { %264 = vst.msk [vmem:[#allocation2 + $0x70] sm:$0xff] %vm79_vm0, %v917_v0  ;;  %265 = vst.msk [vmem:[#allocation2 + $0x78] sm:$0xff] %vm79_vm0, %v917_v0  ;;  %712 = vmatpush3.msra.mxu1 %v165_v7  ;;  %699 = vmatpush3.msra.mxu0 %v76_v8  ;;  %v285_v42 = vld [vmem:[#allocation2 + $0x8] sm:$0xff]  ;;  %p891_p10 = pnand %p890_p9, %p884_p6 }
  0x3a   :  { %266 = vst.msk [vmem:[#allocation2 + $0x80] sm:$0xff] %vm79_vm0, %v917_v0  ;;  %267 = vst.msk [vmem:[#allocation2 + $0x88] sm:$0xff] %vm79_vm0, %v917_v0  ;;  %714 = vmatmul.mubr.msk.f32.vlgmr.msra.gmra.mxu1 %vm79_vm0, %v164_v9  ;;  %700 = vmatprep.subr.mxu0 %v75_v10  ;;  %v287_v38 = vld [vmem:[#allocation2 + $0x18] sm:$0xff]  ;;  %v286_v40 = vld [vmem:[#allocation2 + $0x10] sm:$0xff] }
  0x3b   :  { %268 = vst.msk [vmem:[#allocation2 + $0x90] sm:$0xff] %vm79_vm0, %v917_v0  ;;  %269 = vst.msk [vmem:[#allocation2 + $0x98] sm:$0xff] %vm79_vm0, %v917_v0  ;;  %701 = vmatpush3.msra.mxu0 %v75_v10  ;;  %702 = vmatprep.mubr.msk.f32.mxu0 %vm79_vm0, %v73_v11  ;;  %v289_v34 = vld [vmem:[#allocation2 + $0x28] sm:$0xff]  ;;  %v288_v36 = vld [vmem:[#allocation2 + $0x20] sm:$0xff] }
  0x3c   :  { %270 = vst.msk [vmem:[#allocation2 + $0xa0] sm:$0xff] %vm79_vm0, %v917_v0  ;;  %271 = vst.msk [vmem:[#allocation2 + $0xa8] sm:$0xff] %vm79_vm0, %v917_v0  ;;  %703 = vmatmul.mubr.msk.f32.vlgmr.msra.gmra.mxu0 %vm79_vm0, %v74_v12  ;;  %751 = vmatprep.subr.mxu1 %v917_v0  ;;  %v291_v30 = vld [vmem:[#allocation2 + $0x38] sm:$0xff]  ;;  %v290_v32 = vld [vmem:[#allocation2 + $0x30] sm:$0xff] }
  0x3d   :  { %272 = vst.msk [vmem:[#allocation2 + $0xb0] sm:$0xff] %vm79_vm0, %v917_v0  ;;  %273 = vst.msk [vmem:[#allocation2 + $0xb8] sm:$0xff] %vm79_vm0, %v917_v0  ;;  %716 = vmatprep.subr.mxu0 %v917_v0  ;;  %v293_v26 = vld [vmem:[#allocation2 + $0x48] sm:$0xff]  ;;  %v292_v28 = vld [vmem:[#allocation2 + $0x40] sm:$0xff]  ;;  %783 = vmatprep.mubr.msk.f32.mxu1 %vm918_vm1, %v917_v0 }
  0x3e   :  { %274 = vst.msk [vmem:[#allocation2 + $0xc0] sm:$0xff] %vm79_vm0, %v917_v0  ;;  %275 = vst.msk [vmem:[#allocation2 + $0xc8] sm:$0xff] %vm79_vm0, %v917_v0  ;;  %v295_v22 = vld [vmem:[#allocation2 + $0x58] sm:$0xff]  ;;  %v294_v24 = vld [vmem:[#allocation2 + $0x50] sm:$0xff]  ;;  %748 = vmatprep.mubr.msk.f32.mxu0 %vm918_vm1, %v917_v0 }
  0x3f   :  { %276 = vst.msk [vmem:[#allocation2 + $0xd0] sm:$0xff] %vm79_vm0, %v917_v0  ;;  %277 = vst.msk [vmem:[#allocation2 + $0xd8] sm:$0xff] %vm79_vm0, %v917_v0  ;;  %v297_v18 = vld [vmem:[#allocation2 + $0x68] sm:$0xff]  ;;  %v296_v20 = vld [vmem:[#allocation2 + $0x60] sm:$0xff] }
  0x40   :  { %278 = vst.msk [vmem:[#allocation2 + $0xe0] sm:$0xff] %vm79_vm0, %v917_v0  ;;  %279 = vst.msk [vmem:[#allocation2 + $0xe8] sm:$0xff] %vm79_vm0, %v917_v0  ;;  %v299_v14 = vld [vmem:[#allocation2 + $0x78] sm:$0xff]  ;;  %v298_v16 = vld [vmem:[#allocation2 + $0x70] sm:$0xff] }
  0x41   :  { %280 = vst.msk [vmem:[#allocation2 + $0xf0] sm:$0xff] %vm79_vm0, %v917_v0  ;;  %281 = vst.msk [vmem:[#allocation2 + $0xf8] sm:$0xff] %vm79_vm0, %v917_v0  ;;  %717 = vmatpush3.xpose.msk.msra.mxu0 %vm79_vm0, %v299_v14  ;;  %v301_v41 = vld [vmem:[#allocation2 + $0x88] sm:$0xff] }
  0x42   :  { %718 = vmatprep.subr.mxu0 %v917_v0  ;;  %v303_v37 = vld [vmem:[#allocation2 + $0x98] sm:$0xff]  ;;  %v302_v39 = vld [vmem:[#allocation2 + $0x90] sm:$0xff] }
  0x43   :  { %v305_v33 = vld [vmem:[#allocation2 + $0xa8] sm:$0xff]  ;;  %v304_v35 = vld [vmem:[#allocation2 + $0xa0] sm:$0xff] }
  0x44   :  { %v307_v29 = vld [vmem:[#allocation2 + $0xb8] sm:$0xff]  ;;  %v306_v31 = vld [vmem:[#allocation2 + $0xb0] sm:$0xff] }
  0x45   :  { %719 = vmatpush3.xpose.msk.msra.mxu0 %vm79_vm0, %v298_v16  ;;  %v309_v25 = vld [vmem:[#allocation2 + $0xc8] sm:$0xff]  ;;  %v308_v27 = vld [vmem:[#allocation2 + $0xc0] sm:$0xff] }
  0x46   :  { %720 = vmatprep.subr.mxu0 %v917_v0  ;;  %v311_v21 = vld [vmem:[#allocation2 + $0xd8] sm:$0xff]  ;;  %v310_v23 = vld [vmem:[#allocation2 + $0xd0] sm:$0xff] }
  0x47   :  { %v313_v17 = vld [vmem:[#allocation2 + $0xe8] sm:$0xff]  ;;  %v312_v19 = vld [vmem:[#allocation2 + $0xe0] sm:$0xff] }
  0x48   :  { %v315_v13 = vld [vmem:[#allocation2 + $0xf8] sm:$0xff]  ;;  %v314_v15 = vld [vmem:[#allocation2 + $0xf0] sm:$0xff] }
  0x49   :  { %752 = vmatpush3.xpose.msk.msra.mxu1 %vm79_vm0, %v315_v13  ;;  %721 = vmatpush3.xpose.msk.msra.mxu0 %vm79_vm0, %v297_v18 }
  0x4a   :  { %753 = vmatprep.subr.mxu1 %v917_v0  ;;  %722 = vmatprep.subr.mxu0 %v917_v0 }
  0x4d   :  { %754 = vmatpush3.xpose.msk.msra.mxu1 %vm79_vm0, %v314_v15  ;;  %723 = vmatpush3.xpose.msk.msra.mxu0 %vm79_vm0, %v296_v20 }
  0x4e   :  { %755 = vmatprep.subr.mxu1 %v917_v0  ;;  %724 = vmatprep.subr.mxu0 %v917_v0 }
  0x51   :  { %756 = vmatpush3.xpose.msk.msra.mxu1 %vm79_vm0, %v313_v17  ;;  %725 = vmatpush3.xpose.msk.msra.mxu0 %vm79_vm0, %v295_v22 }
  0x52   :  { %757 = vmatprep.subr.mxu1 %v917_v0  ;;  %726 = vmatprep.subr.mxu0 %v917_v0 }
  0x55   :  { %758 = vmatpush3.xpose.msk.msra.mxu1 %vm79_vm0, %v312_v19  ;;  %727 = vmatpush3.xpose.msk.msra.mxu0 %vm79_vm0, %v294_v24 }
  0x56   :  { %759 = vmatprep.subr.mxu1 %v917_v0  ;;  %728 = vmatprep.subr.mxu0 %v917_v0 }
  0x59   :  { %760 = vmatpush3.xpose.msk.msra.mxu1 %vm79_vm0, %v311_v21  ;;  %729 = vmatpush3.xpose.msk.msra.mxu0 %vm79_vm0, %v293_v26 }
  0x5a   :  { %761 = vmatprep.subr.mxu1 %v917_v0  ;;  %730 = vmatprep.subr.mxu0 %v917_v0 }
  0x5d   :  { %762 = vmatpush3.xpose.msk.msra.mxu1 %vm79_vm0, %v310_v23  ;;  %731 = vmatpush3.xpose.msk.msra.mxu0 %vm79_vm0, %v292_v28 }
  0x5e   :  { %763 = vmatprep.subr.mxu1 %v917_v0  ;;  %732 = vmatprep.subr.mxu0 %v917_v0 }
  0x61   :  { %764 = vmatpush3.xpose.msk.msra.mxu1 %vm79_vm0, %v309_v25  ;;  %733 = vmatpush3.xpose.msk.msra.mxu0 %vm79_vm0, %v291_v30 }
  0x62   :  { %765 = vmatprep.subr.mxu1 %v917_v0  ;;  %734 = vmatprep.subr.mxu0 %v917_v0 }
  0x65   :  { %766 = vmatpush3.xpose.msk.msra.mxu1 %vm79_vm0, %v308_v27  ;;  %735 = vmatpush3.xpose.msk.msra.mxu0 %vm79_vm0, %v290_v32 }
  0x66   :  { %767 = vmatprep.subr.mxu1 %v917_v0  ;;  %736 = vmatprep.subr.mxu0 %v917_v0 }
  0x69   :  { %768 = vmatpush3.xpose.msk.msra.mxu1 %vm79_vm0, %v307_v29  ;;  %737 = vmatpush3.xpose.msk.msra.mxu0 %vm79_vm0, %v289_v34 }
  0x6a   :  { %769 = vmatprep.subr.mxu1 %v917_v0  ;;  %738 = vmatprep.subr.mxu0 %v917_v0 }
  0x6d   :  { %770 = vmatpush3.xpose.msk.msra.mxu1 %vm79_vm0, %v306_v31  ;;  %739 = vmatpush3.xpose.msk.msra.mxu0 %vm79_vm0, %v288_v36 }
  0x6e   :  { %771 = vmatprep.subr.mxu1 %v917_v0  ;;  %740 = vmatprep.subr.mxu0 %v917_v0 }
  0x71   :  { %772 = vmatpush3.xpose.msk.msra.mxu1 %vm79_vm0, %v305_v33  ;;  %741 = vmatpush3.xpose.msk.msra.mxu0 %vm79_vm0, %v287_v38 }
  0x72   :  { %773 = vmatprep.subr.mxu1 %v917_v0  ;;  %742 = vmatprep.subr.mxu0 %v917_v0 }
  0x75   :  { %774 = vmatpush3.xpose.msk.msra.mxu1 %vm79_vm0, %v304_v35  ;;  %743 = vmatpush3.xpose.msk.msra.mxu0 %vm79_vm0, %v286_v40 }
  0x76   :  { %775 = vmatprep.subr.mxu1 %v917_v0  ;;  %744 = vmatprep.subr.mxu0 %v917_v0 }
  0x79   :  { %776 = vmatpush3.xpose.msk.msra.mxu1 %vm79_vm0, %v303_v37  ;;  %745 = vmatpush3.xpose.msk.msra.mxu0 %vm79_vm0, %v285_v42 }
  0x7a   :  { %777 = vmatprep.subr.mxu1 %v917_v0  ;;  %746 = vmatprep.subr.mxu0 %v917_v0 }
  0x7d   :  { %778 = vmatpush3.xpose.msk.msra.mxu1 %vm79_vm0, %v302_v39 }
  0x7e   :  { %779 = vmatprep.subr.mxu1 %v917_v0 }
  0x81   :  { %780 = vmatpush3.xpose.msk.msra.mxu1 %vm79_vm0, %v301_v41 }
  0x82   :  { %781 = vmatprep.subr.mxu1 %v917_v0 }
  0xfa   :  { %v715_v43 = vpop.f32.mrf.mxu1 }
  0xfb   :  { %283 = vst.msk [vmem:[#allocation2 + $0x80] sm:$0xff] %vm79_vm0, %v715_v43 }
  0xfc   :  { %v241_v44 = vpop.f32.mrf.mxu1  ;;  %v704_v45 = vpop.f32.mrf.mxu0 }
  0xfd   :  { %282 = vst.msk [vmem:[#allocation2] sm:$0xff] %vm79_vm0, %v241_v44  ;;  %v162_v46 = vmul.f32 0.17677669, %v704_v45 }
  0xfe   :  { %v152_v48 = vpop.f32.mrf.mxu0 }
  0xff   :  { %v161_v50 = vmul.f32 0.17677669, %v152_v48 }
 0x102   :  { %v300_v47 = vld [vmem:[#allocation2 + $0x80] sm:$0xff] }
 0x103   :  { %782 = vmatpush3.xpose.msk.msra.mxu1 %vm79_vm0, %v300_v47 }
 0x104   :  { %v284_v49 = vld [vmem:[#allocation2] sm:$0xff] }
 0x105   :  { %747 = vmatpush3.xpose.msk.msra.mxu0 %vm79_vm0, %v284_v49 }
 0x106   :  { %784 = vmatmul.mubr.msk.f32.vlgmr.msra.gmra.mxu1 %vm79_vm0, %v162_v46 }
 0x108   :  { %749 = vmatmul.mubr.msk.f32.vlgmr.msra.gmra.mxu0 %vm79_vm0, %v161_v50 }
 0x1c6   :  { %v554_v53 = vpop.f32.mrf.mxu1 }
 0x1c7   :  { %v564_v58 = vsel %vm560_vm2, %v554_v53, -1e+30 }
 0x1c8   :  { %v433_v54 = vpop.f32.mrf.mxu0  ;;  %v785_v55 = vpop.f32.mrf.mxu1 }
 0x1c9   :  { %v563_v56 = vsel %vm560_vm2, %v433_v54, -1e+30 }
 0x1ca   :  { %565 = vmax.xlane.f32.xlu0 %v563_v56  ;;  %v750_v57 = vpop.f32.mrf.mxu0 }
 0x1ce   :  { %567 = vmax.xlane.f32.xlu0 %v564_v58 }
 0x253   :  { %v566_v59 = vpop.xlane.xlu0 %565 }
 0x254   :  { %v569_v60 = vsub.f32 %v563_v56, %v566_v59 }
 0x256   :  { %v571_v61 = vmul.f32 1.442695, %v569_v60 }
 0x257   :  { %v568_v62 = vpop.xlane.xlu0 %567 }
 0x258   :  { %795 = vpow2.f32 %v571_v61  ;;  %v570_v63 = vsub.f32 %v564_v58, %v568_v62 }
 0x25a   :  { %v573_v0 = vmul.f32 1.442695, %v570_v63 }
 0x25c   :  { %797 = vpow2.f32 %v573_v0 }
 0x265   :  { %v796_v1 = vpop.eup %795 }
 0x266   :  { %575 = vadd.xlane.f32.xlu1 %v796_v1 }
 0x269   :  { %v798_v2 = vpop.eup %797 }
 0x26a   :  { %577 = vadd.xlane.f32.xlu1 %v798_v2 }
 0x2ef   :  { %v576_v3 = vpop.xlane.xlu1 %575 }
 0x2f0   :  { %799 = vrcp.f32 %v576_v3 }
 0x2f3   :  { %v578_v4 = vpop.xlane.xlu1 %577 }
 0x2f4   :  { %801 = vrcp.f32 %v578_v4 }
 0x2fd   :  { %v800_v5 = vpop.eup %799 }
 0x2fe   :  { %v581_v6 = vmul.f32 %v800_v5, %v576_v3 }
 0x300   :  { %v583_v7 = vsub.f32 2.0, %v581_v6 }
 0x301   :  { %v802_v8 = vpop.eup %801 }
 0x302   :  { %v585_v9 = vmul.f32 %v800_v5, %v583_v7  ;;  %v582_v10 = vmul.f32 %v802_v8, %v578_v4 }
 0x304   :  { %v584_v11 = vsub.f32 2.0, %v582_v10  ;;  %v587_v12 = vmul.f32 %v796_v1, %v585_v9 }
 0x306   :  { %v586_v13 = vmul.f32 %v802_v8, %v584_v11  ;;  %589 = vst [vmem:[#allocation11] sm:$0xff] %v587_v12 }
 0x308   :  { %v588_v14 = vmul.f32 %v798_v2, %v586_v13 }
 0x30a   :  { %590 = vst [vmem:[#allocation11 + $0x8] sm:$0xff] %v588_v14 }
 0x30b   :  { %894 = shalt.err (!%p891_p10)
}
 0x30c   :  { %602 = dma.vmem_to_hbm [thread:$0]  %s597_s3, 256, %s1117_s4, [#allocation5], %s913_s20, %s913_s20, %s914_s21  }
 0x30d   :  { %909 = dma.done.wait [#allocation5], 256  }
 0x30e   :  { %910 = vsyncadd [#allocation5], 4294967040 }
 0x30f   :  { %606 = vsyncpa [#allocation4], 1 }
 0x310   :  { %607 = vsyncpa [#allocation7], 1 }
 0x311   :  { %608 = vsyncpa [#allocation10], 1 }
 0x312   :  { %609 = vsyncpa [#allocation5], 1 }

</bundles_post_ra>
